<compile_context>
chip_gen: v5e
topology: v5e:2x2
jax: 0.10.0
libtpu: 0.0.40
codegen_flags: <defaults>
</compile_context>

<pallas_src>
import jax
import jax.numpy as jnp
import numpy as np
from jax.experimental import pallas as pl
from jax.experimental.pallas import tpu as pltpu

_LANE = 128                          # TPU vreg lane width
_TARGET_BLOCK_BYTES = 4 * 1024 * 1024   # ~4 MiB per block
_VMEM_LIMIT_BYTES = 32 * 1024 * 1024    # headroom for 2 arrays x 2 buffers x 4 MiB


def _copy_kernel(x_ref, o_ref):
    # Pure identity copy of the current block (DMA-in -> DMA-out).
    o_ref[...] = x_ref[...]


def _sublane_multiple(dtype) -> int:
    """Minimum sublane tile for this dtype: 8 (32-bit), 16 (bf16), 32 (int8/fp8)."""
    itemsize = jnp.dtype(dtype).itemsize
    return max(8, 32 // max(1, itemsize))


def _pick_block_rows(rows: int, dtype) -> int:
    """Pick a lane-dense block height near ~4 MiB, sublane-aligned, preferring
    an exact divisor of `rows` to avoid a ragged (masked) last grid step."""
    itemsize = jnp.dtype(dtype).itemsize
    sub = _sublane_multiple(dtype)
    target = max(sub, _TARGET_BLOCK_BYTES // (_LANE * itemsize))
    if rows <= target:
        return rows  # block == full array dim -> always legal, single step
    best = max(sub, (target // sub) * sub)
    if rows % best == 0:
        return best
    cand = best
    for _ in range(64):  # cheap bounded search for a nearby divisor
        cand -= sub
        if cand < sub:
            break
        if rows % cand == 0:
            return cand
    return best


def _tiled_copy(flat2d):
    """Copy a (rows, 128) lane-dense array with a double-buffered 1-D grid."""
    rows = flat2d.shape[0]
    block_rows = _pick_block_rows(rows, flat2d.dtype)
    grid = (pl.cdiv(rows, block_rows),)
    return pl.pallas_call(
        _copy_kernel,
        out_shape=jax.ShapeDtypeStruct(flat2d.shape, flat2d.dtype),
        grid=grid,
        in_specs=[pl.BlockSpec((block_rows, _LANE), lambda i: (i, 0))],
        out_specs=pl.BlockSpec((block_rows, _LANE), lambda i: (i, 0)),
        input_output_aliases={0: 0},
        compiler_params=pltpu.CompilerParams(
            dimension_semantics=("parallel",),
            vmem_limit_bytes=_VMEM_LIMIT_BYTES,
        ),
    )(flat2d)


def _small_copy(flat2d):
    """Single-block copy for a tiny (< 128-element) tail."""
    return pl.pallas_call(
        _copy_kernel,
        out_shape=jax.ShapeDtypeStruct(flat2d.shape, flat2d.dtype),
        compiler_params=pltpu.CompilerParams(
            vmem_limit_bytes=_VMEM_LIMIT_BYTES),
    )(flat2d)


def identity_forward(feat, feat_ref=None, is_train=False):
    """Pallas implementation of Identity.forward: returns feat unchanged.

    (The zero-cost implementation is simply `return feat`; the kernelized copy
    below exists because the task requires a Pallas forward pass.)
    """
    del feat_ref, is_train  # Identity never reads these.

    orig_shape = feat.shape
    n = feat.size
    if n == 0:
        return feat

    rows = n // _LANE
    tail = n - rows * _LANE

    if tail == 0:
        # Lane-dense layout: last dim exactly 128 -> unmasked full-width stores.
        return _tiled_copy(feat.reshape(rows, _LANE)).reshape(orig_shape)

    # Bounded fallback: tiled lane-dense bulk + tiny tail (< 128 elements),
    # so no path ever keeps the whole array resident in VMEM.
    flat = feat.reshape(-1)
    pieces = []
    if rows > 0:
        bulk = flat[: rows * _LANE].reshape(rows, _LANE)
        pieces.append(_tiled_copy(bulk).reshape(-1))
    tail_arr = flat[rows * _LANE:].reshape(1, tail)
    pieces.append(_small_copy(tail_arr).reshape(-1))
    out = pieces[0] if len(pieces) == 1 else jnp.concatenate(pieces)
    return out.reshape(orig_shape)


if __name__ == "__main__":
    key = jax.random.PRNGKey(0)
    k1, k2 = jax.random.split(key)
    feat = jax.random.normal(k1, (2, 4, 16, 16), dtype=jnp.float32)
    feat_ref = jax.random.normal(k2, (2, 4, 16, 16), dtype=jnp.float32)

    # Host copy taken before the call so the check is valid even if feat's
    # device buffer is donated / aliased by a caller.
    feat_host = np.asarray(feat)

    out = identity_forward(feat, feat_ref, is_train=False)
    out = jax.block_until_ready(out)

    assert out.shape == feat.shape and out.dtype == feat.dtype
    np.testing.assert_array_equal(np.asarray(out), feat_host)
    print("KERNEL_OK")
</pallas_src>

<mosaic_0001>
module attributes {stable_mosaic.version = 11 : i64} {
  func.func @_copy_kernel(%arg0: i32, %arg1: memref<16x128xf32, #tpu.memory_space<vmem>>, %arg2: memref<16x128xf32, #tpu.memory_space<vmem>>) attributes {dimension_semantics = [#tpu.dimension_semantics<parallel>], iteration_bounds = array<i64: 1>, scalar_prefetch = 0 : i64, scratch_operands = 0 : i64, tpu.core_type = #tpu.core_type<tc>, window_params = [{transform_indices = @transform_0, window_bounds = array<i64: 16, 128>}, {transform_indices = @transform_1, window_bounds = array<i64: 16, 128>}]} {
    %c0 = arith.constant 0 : index
    %c0_0 = arith.constant 0 : index
    %0 = vector.load %arg1[%c0, %c0_0] : memref<16x128xf32, #tpu.memory_space<vmem>>, vector<16x128xf32>
    %c0_1 = arith.constant 0 : index
    %c0_2 = arith.constant 0 : index
    %1 = vector.load %arg2[%c0_1, %c0_2] : memref<16x128xf32, #tpu.memory_space<vmem>>, vector<16x128xf32>
    tpu.vector_store %arg2[%c0_1, %c0_2], %0 {strides = array<i32>} : memref<16x128xf32, #tpu.memory_space<vmem>>, vector<16x128xf32>,
    return
  }
  func.func @transform_0(%arg0: i32) -> (i32, i32) {
    %c0_i32 = arith.constant 0 : i32
    %c0_i32_0 = arith.constant 0 : i32
    return %arg0, %c0_i32 : i32, i32
  }
  func.func @transform_1(%arg0: i32) -> (i32, i32) {
    %c0_i32 = arith.constant 0 : i32
    %c0_i32_0 = arith.constant 0 : i32
    return %arg0, %c0_i32 : i32, i32
  }
}

</mosaic_0001>

<bundles_post_ra>
// kernel: tpu_custom_call.1
= control target key start
LH: loop header
LB: loop body
LE: loop exit
PB: predicated region body
PF: predicated region fallthrough
CT: control target
= control target key end

     0   :  { %6 = vsyncpa [#allocation3], 0  ;;  %s124_s0 = inlined_call_operand.hbm [shape: f32[16,128], index: 0, kind: input, shape index: {}, may-alias: {0,1}]   ;;  %s125_s1 = inlined_call_operand.hbm [shape: f32[16,128], index: 1, kind: output, shape index: {}, may-alias: {0,1}]  }
   0x1   :  { %7 = vsyncpa [#allocation4], 0  ;;  %s12_s8 = sshll.u32 %s124_s0, 4  ;;  %s104_s9 = smov [#allocation2]   ;;  %s13_s8 = int_to_ptr.hbm [resolvable:$true] %s12_s8 }
   0x2   :  { %s14_s10 = sshll.u32 %s104_s9, 4  ;;  %s105_s11 = smov 128   ;;  %s15_s10 = int_to_ptr.vmem [resolvable:$true] %s14_s10 }
   0x3   :  { %s106_s12 = smov 8  }
   0x4   :  { %20 = dma.hbm_to_vmem [thread:$0]  %s13_s8, 256, %s15_s10, [#allocation3], %s105_s11, %s105_s11, %s106_s12  }
   0x5   :  { %100 = dma.done.wait [#allocation3], 256  }
   0x6   :  { %101 = vsyncadd [#allocation3], 4294967040  ;;  %s107_s13 = smov [#allocation5]   ;;  %s35_s17 = sshll.u32 %s125_s1, 4  ;;  %v25_v0 = vld [vmem:[#allocation2] sm:$0xff]  ;;  %v26_v1 = vld [vmem:[#allocation2 + $0x8] sm:$0xff]  ;;  %s36_s17 = int_to_ptr.hbm [resolvable:$true] %s35_s17 }
   0x7   :  { %s33_s14 = sshll.u32 %s107_s13, 4  ;;  %27 = vst [vmem:[#allocation5] sm:$0xff] %v25_v0  ;;  %s34_s14 = int_to_ptr.vmem [resolvable:$true] %s33_s14 }
   0x8   :  { %28 = vst [vmem:[#allocation5 + $0x8] sm:$0xff] %v26_v1 }
   0x9   :  { %41 = dma.vmem_to_hbm [thread:$0]  %s34_s14, 256, %s36_s17, [#allocation4], %s105_s11, %s105_s11, %s106_s12  }
   0xa   :  { %102 = dma.done.wait [#allocation4], 256  }
   0xb   :  { %103 = vsyncadd [#allocation4], 4294967040 }
   0xc   :  { %46 = vsyncpa [#allocation3], 1 }
   0xd   :  { %47 = vsyncpa [#allocation4], 1 }

</bundles_post_ra>
